<compile_context>
chip_gen: v6e
topology: v6e:2x2x1
jax: 0.10.0
libtpu: 0.0.40
codegen_flags: <defaults>
</compile_context>

<pallas_src>
import functools

import jax
import jax.numpy as jnp
from jax import lax
from jax.experimental import pallas as pl
from jax.experimental.pallas import tpu as pltpu


def _lightgcn_fused_kernel(layer_num, inv_layers,
                           graph_ref, emb_ref,       # VMEM (N,N), (N,Dp) compute dtype
                           users_ref, items_ref,     # VMEM (B,1) int32 (items pre-offset)
                           out_ref):                 # VMEM (B,1) f32 scores
    g = graph_ref[...]                               # (N, N)
    e = emb_ref[...]                                 # (N, Dp)

    # --- propagate: light = mean_{l=0..L} G^l @ E  (MXU matmuls, f32 accumulate) ---
    acc = e.astype(jnp.float32)
    cur = e
    for _ in range(layer_num):                       # static unroll; layer_num is a Python int
        nxt = jnp.dot(g, cur, preferred_element_type=jnp.float32)
        acc = acc + nxt
        cur = nxt.astype(g.dtype)                    # next MXU input stays in compute dtype
    light = acc * inv_layers                         # (N, Dp) f32, mean over (L+1) terms

    # --- vectorized gather via one-hot selection matrices + MXU matmuls ---
    n = g.shape[0]
    b = out_ref.shape[0]
    col = lax.broadcasted_iota(jnp.int32, (b, n), 1)            # (B, N) column ids
    u_sel = (col == users_ref[...]).astype(jnp.float32)         # (B, N) one-hot rows
    i_sel = (col == items_ref[...]).astype(jnp.float32)         # (B, N) one-hot rows

    u_gath = jnp.dot(u_sel, light, preferred_element_type=jnp.float32)   # (B, Dp)
    i_gath = jnp.dot(i_sel, light, preferred_element_type=jnp.float32)   # (B, Dp)

    # --- score: <u, i> per row.  XLU lane reduce; zero-padded cols contribute 0. ---
    out_ref[...] = jnp.sum(u_gath * i_gath, axis=-1, keepdims=True)


def lightgcn_forward(graph, user_embs, item_embs, users, items, layer_num,
                     *, compute_dtype=jnp.float32):
    """predicts[b] = <light_out[users[b]], light_out[user_num + items[b]]>."""
    user_num = user_embs.shape[0]
    all_emb = jnp.concatenate([user_embs, item_embs], axis=0)
    n, d = all_emb.shape
    b = users.shape[0]

    # Zero-pad the embedding dim to a full 128-lane multiple (exact no-op math).
    d_pad = ((d + 127) // 128) * 128
    emb_pad = jnp.zeros((n, d_pad), compute_dtype)
    emb_pad = emb_pad.at[:, :d].set(all_emb.astype(compute_dtype))
    g = graph.astype(compute_dtype)

    users2d = users.astype(jnp.int32).reshape(b, 1)
    items2d = (items.astype(jnp.int32) + user_num).reshape(b, 1)   # offset into concat table

    kernel = functools.partial(_lightgcn_fused_kernel, layer_num,
                               1.0 / float(layer_num + 1))

    itemsize = jnp.dtype(compute_dtype).itemsize
    cost = pl.CostEstimate(
        flops=2 * layer_num * n * n * d_pad + 2 * 2 * b * n * d_pad,
        transcendentals=0,
        bytes_accessed=n * n * itemsize + n * d_pad * itemsize + 3 * b * 4,
    )

    scores = pl.pallas_call(
        kernel,
        out_shape=jax.ShapeDtypeStruct((b, 1), jnp.float32),
        in_specs=[
            pl.BlockSpec(memory_space=pltpu.MemorySpace.VMEM),   # graph
            pl.BlockSpec(memory_space=pltpu.MemorySpace.VMEM),   # padded embeddings
            pl.BlockSpec(memory_space=pltpu.MemorySpace.VMEM),   # user indices
            pl.BlockSpec(memory_space=pltpu.MemorySpace.VMEM),   # item indices (offset)
        ],
        out_specs=pl.BlockSpec(memory_space=pltpu.MemorySpace.VMEM),
        cost_estimate=cost,
    )(g, emb_pad, users2d, items2d)
    return scores[:, 0]


if __name__ == "__main__":
    USER_NUM, ITEM_NUM, EMB_DIM, LAYER_NUM, BATCH = 48, 80, 32, 2, 8
    N = USER_NUM + ITEM_NUM  # 128

    key = jax.random.PRNGKey(0)
    k_inter, k_user, k_item, k_u_idx, k_i_idx = jax.random.split(key, 5)

    # Deterministic synthetic bipartite interaction graph + symmetric normalization
    # (equivalent of data.get_symmetrically_normalized_matrix()).
    inter = (jax.random.uniform(k_inter, (USER_NUM, ITEM_NUM)) < 0.1).astype(jnp.float32)
    adj = jnp.zeros((N, N), jnp.float32)
    adj = adj.at[:USER_NUM, USER_NUM:].set(inter)
    adj = adj.at[USER_NUM:, :USER_NUM].set(inter.T)
    deg = jnp.maximum(adj.sum(axis=1), 1.0)
    d_inv_sqrt = 1.0 / jnp.sqrt(deg)
    graph = adj * d_inv_sqrt[:, None] * d_inv_sqrt[None, :]

    # nn.Embedding default init: N(0, 1).
    user_embs = jax.random.normal(k_user, (USER_NUM, EMB_DIM), jnp.float32)
    item_embs = jax.random.normal(k_item, (ITEM_NUM, EMB_DIM), jnp.float32)

    users = jax.random.randint(k_u_idx, (BATCH,), 0, USER_NUM)
    items = jax.random.randint(k_i_idx, (BATCH,), 0, ITEM_NUM)

    # Pure-JAX reference of the PyTorch forward.
    all_emb = jnp.concatenate([user_embs, item_embs], axis=0)
    embs = [all_emb]
    cur = all_emb
    for _ in range(LAYER_NUM):
        cur = graph @ cur
        embs.append(cur)
    light_out = jnp.mean(jnp.stack(embs, axis=1), axis=1)
    ref = jnp.sum(light_out[users] * light_out[USER_NUM + items], axis=1)

    # f32 path — exact numerics.
    predicts = lightgcn_forward(graph, user_embs, item_embs, users, items, LAYER_NUM)
    predicts = jax.block_until_ready(predicts)
    assert predicts.shape == (BATCH,)
    assert jnp.allclose(predicts, ref, atol=1e-4, rtol=1e-4), (predicts, ref)

    # bf16 MXU-operand path (f32 accumulation/elementwise) — looser tolerance.
    predicts_bf16 = lightgcn_forward(graph, user_embs, item_embs, users, items,
                                     LAYER_NUM, compute_dtype=jnp.bfloat16)
    predicts_bf16 = jax.block_until_ready(predicts_bf16)
    assert predicts_bf16.shape == (BATCH,)
    assert jnp.allclose(predicts_bf16, ref, atol=2e-1, rtol=1e-1), (predicts_bf16, ref)

    print("KERNEL_OK")
</pallas_src>

<mosaic_0001>
module attributes {stable_mosaic.version = 11 : i64} {
  func.func @_lightgcn_fused_kernel(%arg0: memref<128x128xf32, #tpu.memory_space<vmem>>, %arg1: memref<128x128xf32, #tpu.memory_space<vmem>>, %arg2: memref<8x1xi32, #tpu.memory_space<vmem>>, %arg3: memref<8x1xi32, #tpu.memory_space<vmem>>, %arg4: memref<8x1xf32, #tpu.memory_space<vmem>>) attributes {dimension_semantics = [], scalar_prefetch = 0 : i64, scratch_operands = 0 : i64, tpu.core_type = #tpu.core_type<tc>} {
    %c0 = arith.constant 0 : index
    %c0_0 = arith.constant 0 : index
    %0 = vector.load %arg0[%c0, %c0_0] : memref<128x128xf32, #tpu.memory_space<vmem>>, vector<128x128xf32>
    %c0_1 = arith.constant 0 : index
    %c0_2 = arith.constant 0 : index
    %1 = vector.load %arg1[%c0_1, %c0_2] : memref<128x128xf32, #tpu.memory_space<vmem>>, vector<128x128xf32>
    %cst = arith.constant dense<0.000000e+00> : vector<128x128xf32>
    %2 = tpu.matmul %0, %1, %cst {dimension_numbers = #tpu.dot_dimension_numbers<[1], [0], [0], [1], [0, 0, 1, 1], [], []>} : vector<128x128xf32>, vector<128x128xf32>, vector<128x128xf32> -> vector<128x128xf32>
    %3 = arith.addf %1, %2 : vector<128x128xf32>
    %cst_3 = arith.constant dense<0.000000e+00> : vector<128x128xf32>
    %4 = tpu.matmul %0, %2, %cst_3 {dimension_numbers = #tpu.dot_dimension_numbers<[1], [0], [0], [1], [0, 0, 1, 1], [], []>} : vector<128x128xf32>, vector<128x128xf32>, vector<128x128xf32> -> vector<128x128xf32>
    %5 = arith.addf %3, %4 : vector<128x128xf32>
    %cst_4 = arith.constant 0.333333343 : f32
    %6 = vector.broadcast %cst_4 : f32 to vector<128x128xf32>
    %7 = arith.mulf %5, %6 : vector<128x128xf32>
    %8 = tpu.iota {dimensions = array<i32: 1>} : vector<8x128xi32>
    %c0_5 = arith.constant 0 : index
    %c0_6 = arith.constant 0 : index
    %9 = vector.load %arg2[%c0_5, %c0_6] : memref<8x1xi32, #tpu.memory_space<vmem>>, vector<8x1xi32>
    %10 = vector.broadcast %9 : vector<8x1xi32> to vector<8x128xi32>
    %11 = arith.cmpi eq, %8, %10 : vector<8x128xi32>
    %12 = arith.extui %11 : vector<8x128xi1> to vector<8x128xi32>
    %13 = arith.sitofp %12 : vector<8x128xi32> to vector<8x128xf32>
    %c0_7 = arith.constant 0 : index
    %c0_8 = arith.constant 0 : index
    %14 = vector.load %arg3[%c0_7, %c0_8] : memref<8x1xi32, #tpu.memory_space<vmem>>, vector<8x1xi32>
    %15 = vector.broadcast %14 : vector<8x1xi32> to vector<8x128xi32>
    %16 = arith.cmpi eq, %8, %15 : vector<8x128xi32>
    %17 = arith.extui %16 : vector<8x128xi1> to vector<8x128xi32>
    %18 = arith.sitofp %17 : vector<8x128xi32> to vector<8x128xf32>
    %cst_9 = arith.constant dense<0.000000e+00> : vector<8x128xf32>
    %19 = tpu.matmul %13, %7, %cst_9 {dimension_numbers = #tpu.dot_dimension_numbers<[1], [0], [0], [1], [0, 0, 1, 1], [], []>} : vector<8x128xf32>, vector<128x128xf32>, vector<8x128xf32> -> vector<8x128xf32>
    %cst_10 = arith.constant dense<0.000000e+00> : vector<8x128xf32>
    %20 = tpu.matmul %18, %7, %cst_10 {dimension_numbers = #tpu.dot_dimension_numbers<[1], [0], [0], [1], [0, 0, 1, 1], [], []>} : vector<8x128xf32>, vector<128x128xf32>, vector<8x128xf32> -> vector<8x128xf32>
    %21 = arith.mulf %19, %20 : vector<8x128xf32>
    %cst_11 = arith.constant dense<0.000000e+00> : vector<8xf32>
    %22 = vector.multi_reduction <add>, %21, %cst_11 [1] : vector<8x128xf32> to vector<8xf32>
    %23 = vector.shape_cast %22 : vector<8xf32> to vector<8x1xf32>
    %c0_12 = arith.constant 0 : index
    %c0_13 = arith.constant 0 : index
    %24 = vector.load %arg4[%c0_12, %c0_13] : memref<8x1xf32, #tpu.memory_space<vmem>>, vector<8x1xf32>
    tpu.vector_store %arg4[%c0_12, %c0_13], %23 {strides = array<i32>} : memref<8x1xf32, #tpu.memory_space<vmem>>, vector<8x1xf32>,
    return
  }
}

</mosaic_0001>

<bundles_post_ra>
// kernel: tpu_custom_call.1
= control target key start
LH: loop header
LB: loop body
LE: loop exit
PB: predicated region body
PF: predicated region fallthrough
CT: control target
= control target key end

     0   :  { %9 = vsyncpa [#allocation3], 0  ;;  %s1239_s0 = inlined_call_operand.hbm [shape: f32[128,128], index: 0, kind: input, shape index: {}]   ;;  %s1240_s1 = inlined_call_operand.hbm [shape: f32[128,128], index: 1, kind: input, shape index: {}]   ;;  %s1241_s2 = inlined_call_operand.vmem [shape: s32[8,1], index: 2, kind: input, shape index: {}]   ;;  %s1242_s3 = inlined_call_operand.vmem [shape: s32[8,1], index: 3, kind: input, shape index: {}]   ;;  %s1243_s4 = inlined_call_operand.vmem [shape: f32[8,1], index: 4, kind: output, shape index: {}]  }
   0x1   :  { %10 = vsyncpa [#allocation5], 0  ;;  %s919_s15 = smov [#allocation2]  }
   0x2   :  { %s16_s16 = sshll.u32 %s919_s15, 4  ;;  %s17_s16 = int_to_ptr.vmem [resolvable:$true] %s16_s16 }
   0x3   :  { %s883_s17 = scalar_lea.vmem %s17_s16, 2048  ;;  %p888_p1 = scmp.lt.s32.totalorder %s17_s16, %s17_s16 }
   0x4   :  { %p884_p0 = scmp.ne.s32.totalorder %s17_s16, %s883_s17  ;;  %p889_p2 = scmp.lt.s32.totalorder %s883_s17, %s883_s17 }
   0x6   :  { %p890_p3 = por %p889_p2, %p888_p1 }
   0x8   :  { %p891_p4 = pnand %p890_p3, %p884_p0 }
   0xa   :  { %894 = shalt.err (!%p891_p4)
}
   0xb   :  { %s920_s18 = smov 128   ;;  %s921_s19 = smov 8  }
   0xc   :  { %22 = dma.hbm_to_vmem [thread:$0]  %s1239_s0, 2048, %s17_s16, [#allocation3], %s920_s18, %s920_s18, %s921_s19  }
   0xd   :  { %s922_s22 = smov [#allocation4]  }
   0xe   :  { %s28_s23 = sshll.u32 %s922_s22, 4  ;;  %s29_s23 = int_to_ptr.vmem [resolvable:$true] %s28_s23 }
   0xf   :  { %s903_s24 = scalar_lea.vmem %s29_s23, 2048  ;;  %p908_p6 = scmp.lt.s32.totalorder %s29_s23, %s29_s23 }
  0x10   :  { %p904_p5 = scmp.ne.s32.totalorder %s29_s23, %s903_s24  ;;  %p909_p7 = scmp.lt.s32.totalorder %s903_s24, %s903_s24 }
  0x12   :  { %p910_p8 = por %p909_p7, %p908_p6 }
  0x14   :  { %p911_p9 = pnand %p910_p8, %p904_p5 }
  0x16   :  { %914 = shalt.err (!%p911_p9)
}
  0x17   :  { %34 = dma.hbm_to_vmem [thread:$0]  %s1240_s1, 2048, %s29_s23, [#allocation5], %s920_s18, %s920_s18, %s921_s19  }
  0x18   :  { %915 = dma.done.wait [#allocation3], 2048  }
  0x19   :  { %916 = vsyncadd [#allocation3], 4294965248 }
  0x1a   :  { %917 = dma.done.wait [#allocation5], 2048  }
  0x1b   :  { %918 = vsyncadd [#allocation5], 4294965248  ;;  %v958_v0 = vld [vmem:[#allocation4 + $0x78] sm:$0xff]  ;;  %v960_v1 = vld [vmem:[#allocation4 + $0x70] sm:$0xff]  ;;  %v923_v33 = vmov 0   ;;  %v924_v51 = vmov 0.0  }
  0x1c   :  { %684 = vmatprep.subr.mxu0 %v958_v0  ;;  %v964_v2 = vld [vmem:[#allocation4 + $0x68] sm:$0xff]  ;;  %v968_v3 = vld [vmem:[#allocation4 + $0x60] sm:$0xff]  ;;  %v972_v5 = vld [vmem:[#allocation4 + $0x58] sm:$0xff]  ;;  %874 = vset.pattern.permute.xlu0 %v923_v33  ;;  %vm925_vm0 = vmmov 0   ;;  %vm574_vm3 = vcmask 7168  }
  0x1d   :  { %685 = vmatpush3.msra.mxu0 %v958_v0  ;;  %v45_v4 = vld [vmem:[#allocation2] sm:$0xff]  ;;  %v976_v6 = vld [vmem:[#allocation4 + $0x50] sm:$0xff]  ;;  %v980_v7 = vld [vmem:[#allocation4 + $0x48] sm:$0xff] }
  0x1e   :  { %686 = vmatprep.subr.mxu0 %v960_v1  ;;  %716 = vmatprep.mubr.f32.mxu0 %v45_v4  ;;  %v984_v8 = vld [vmem:[#allocation4 + $0x40] sm:$0xff]  ;;  %v988_v9 = vld [vmem:[#allocation4 + $0x38] sm:$0xff]  ;;  %v992_v10 = vld [vmem:[#allocation4 + $0x30] sm:$0xff] }
  0x1f   :  { %687 = vmatpush3.msra.mxu0 %v960_v1  ;;  %772 = vmatprep.mubr.f32.mxu1 %v45_v4  ;;  %v996_v11 = vld [vmem:[#allocation4 + $0x28] sm:$0xff]  ;;  %v1000_v12 = vld [vmem:[#allocation4 + $0x20] sm:$0xff]  ;;  %v1004_v13 = vld [vmem:[#allocation4 + $0x18] sm:$0xff] }
  0x20   :  { %688 = vmatprep.subr.mxu0 %v964_v2  ;;  %v1008_v14 = vld [vmem:[#allocation4 + $0x10] sm:$0xff]  ;;  %v1012_v15 = vld [vmem:[#allocation4 + $0x8] sm:$0xff]  ;;  %v1016_v16 = vld [vmem:[#allocation4] sm:$0xff] }
  0x21   :  { %689 = vmatpush3.msra.mxu0 %v964_v2  ;;  %v1020_v17 = vld [vmem:[#allocation2 + $0x8] sm:$0xff]  ;;  %v1023_v18 = vld [vmem:[#allocation2 + $0x10] sm:$0xff]  ;;  %v1028_v19 = vld [vmem:[#allocation2 + $0x18] sm:$0xff] }
  0x22   :  { %690 = vmatprep.subr.mxu0 %v968_v3  ;;  %v1030_v20 = vld [vmem:[#allocation2 + $0x20] sm:$0xff]  ;;  %v1034_v21 = vld [vmem:[#allocation2 + $0x28] sm:$0xff]  ;;  %v1036_v22 = vld [vmem:[#allocation2 + $0x30] sm:$0xff] }
  0x23   :  { %691 = vmatpush3.msra.mxu0 %v968_v3  ;;  %v1040_v23 = vld [vmem:[#allocation2 + $0x38] sm:$0xff]  ;;  %v1042_v24 = vld [vmem:[#allocation2 + $0x40] sm:$0xff]  ;;  %v1046_v25 = vld [vmem:[#allocation2 + $0x48] sm:$0xff] }
  0x24   :  { %692 = vmatprep.subr.mxu0 %v972_v5  ;;  %v1048_v26 = vld [vmem:[#allocation2 + $0x50] sm:$0xff]  ;;  %v1052_v27 = vld [vmem:[#allocation2 + $0x58] sm:$0xff]  ;;  %v1054_v28 = vld [vmem:[#allocation2 + $0x60] sm:$0xff] }
  0x25   :  { %693 = vmatpush3.msra.mxu0 %v972_v5  ;;  %v1058_v29 = vld [vmem:[#allocation2 + $0x68] sm:$0xff]  ;;  %v1060_v30 = vld [vmem:[#allocation2 + $0x70] sm:$0xff]  ;;  %v1064_v31 = vld [vmem:[#allocation2 + $0x78] sm:$0xff] }
  0x26   :  { %694 = vmatprep.subr.mxu0 %v976_v6  ;;  %v417_v32 = vld [vmem:[%s1241_s2] sm:$0xff] }
  0x27   :  { %695 = vmatpush3.msra.mxu0 %v976_v6  ;;  %419 = vperm.xlu0 %874, %v417_v32   ;;  %v424_v34 = vld [vmem:[%s1242_s3] sm:$0xff] }
  0x28   :  { %696 = vmatprep.subr.mxu0 %v980_v7 }
  0x29   :  { %697 = vmatpush3.msra.mxu0 %v980_v7 }
  0x2a   :  { %698 = vmatprep.subr.mxu0 %v984_v8 }
  0x2b   :  { %699 = vmatpush3.msra.mxu0 %v984_v8  ;;  %426 = vperm.xlu0 %874, %v424_v34  }
  0x2c   :  { %700 = vmatprep.subr.mxu0 %v988_v9 }
  0x2d   :  { %701 = vmatpush3.msra.mxu0 %v988_v9 }
  0x2e   :  { %702 = vmatprep.subr.mxu0 %v992_v10 }
  0x2f   :  { %703 = vmatpush3.msra.mxu0 %v992_v10 }
  0x30   :  { %704 = vmatprep.subr.mxu0 %v996_v11 }
  0x31   :  { %705 = vmatpush3.msra.mxu0 %v996_v11 }
  0x32   :  { %706 = vmatprep.subr.mxu0 %v1000_v12 }
  0x33   :  { %707 = vmatpush3.msra.mxu0 %v1000_v12 }
  0x34   :  { %708 = vmatprep.subr.mxu0 %v1004_v13 }
  0x35   :  { %709 = vmatpush3.msra.mxu0 %v1004_v13 }
  0x36   :  { %710 = vmatprep.subr.mxu0 %v1008_v14 }
  0x37   :  { %711 = vmatpush3.msra.mxu0 %v1008_v14 }
  0x38   :  { %712 = vmatprep.subr.mxu0 %v1012_v15 }
  0x39   :  { %713 = vmatpush3.msra.mxu0 %v1012_v15 }
  0x3a   :  { %714 = vmatprep.subr.mxu0 %v1016_v16 }
  0x3b   :  { %715 = vmatpush3.msra.mxu0 %v1016_v16 }
  0x3c   :  { %717 = vmatmul.mubr.f32.vlgmr.msra.gmra.mxu0 %v1020_v17  ;;  %796 = vmatprep.subr.mxu0 %v924_v51 }
  0x3d   :  { %719 = vmatprep.mubr.f32.mxu0 %v1023_v18 }
  0x40   :  { %720 = vmatmul.mubr.f32.gmra.mxu0 %v1028_v19 }
  0x41   :  { %722 = vmatprep.mubr.f32.mxu0 %v1030_v20 }
  0x44   :  { %723 = vmatmul.mubr.f32.gmra.mxu0 %v1034_v21 }
  0x45   :  { %725 = vmatprep.mubr.f32.mxu0 %v1036_v22 }
  0x48   :  { %726 = vmatmul.mubr.f32.gmra.mxu0 %v1040_v23 }
  0x49   :  { %728 = vmatprep.mubr.f32.mxu0 %v1042_v24 }
  0x4c   :  { %729 = vmatmul.mubr.f32.gmra.mxu0 %v1046_v25 }
  0x4d   :  { %731 = vmatprep.mubr.f32.mxu0 %v1048_v26 }
  0x50   :  { %732 = vmatmul.mubr.f32.gmra.mxu0 %v1052_v27 }
  0x51   :  { %734 = vmatprep.mubr.f32.mxu0 %v1054_v28 }
  0x54   :  { %735 = vmatmul.mubr.f32.gmra.mxu0 %v1058_v29 }
  0x55   :  { %737 = vmatprep.mubr.f32.mxu0 %v1060_v30 }
  0x58   :  { %738 = vmatmul.mubr.f32.gmra.mxu0 %v1064_v31 }
  0x59   :  { %828 = vmatprep.mubr.msk.f32.mxu0 %vm925_vm0, %v924_v51 }
  0xfc   :  { %v1073_v35 = vpop.f32.mrf.mxu0 }
  0xfe   :  { %v1075_v36 = vpop.f32.mrf.mxu0 }
 0x100   :  { %v1077_v37 = vpop.f32.mrf.mxu0 }
 0x102   :  { %v1079_v38 = vpop.f32.mrf.mxu0 }
 0x104   :  { %v1081_v39 = vpop.f32.mrf.mxu0 }
 0x106   :  { %v1083_v40 = vpop.f32.mrf.mxu0 }
 0x108   :  { %v1085_v41 = vpop.f32.mrf.mxu0 }
 0x10a   :  { %v1087_v42 = vpop.f32.mrf.mxu0 }
 0x10c   :  { %v1089_v43 = vpop.f32.mrf.mxu0 }
 0x10e   :  { %v1091_v44 = vpop.f32.mrf.mxu0 }
 0x110   :  { %v1093_v45 = vpop.f32.mrf.mxu0 }
 0x112   :  { %v1095_v46 = vpop.f32.mrf.mxu0 }
 0x114   :  { %v1097_v47 = vpop.f32.mrf.mxu0 }
 0x116   :  { %v1099_v48 = vpop.f32.mrf.mxu0 }
 0x118   :  { %v1101_v49 = vpop.f32.mrf.mxu0 }
 0x119   :  { %740 = vmatprep.subr.mxu1 %v1101_v49 }
 0x11a   :  { %v1104_v50 = vpop.f32.mrf.mxu0  ;;  %741 = vmatpush3.msra.mxu1 %v1101_v49 }
 0x11b   :  { %742 = vmatprep.subr.mxu1 %v1104_v50 }
 0x11c   :  { %743 = vmatpush3.msra.mxu1 %v1104_v50 }
 0x11d   :  { %744 = vmatprep.subr.mxu1 %v1097_v47 }
 0x11e   :  { %745 = vmatpush3.msra.mxu1 %v1097_v47 }
 0x11f   :  { %746 = vmatprep.subr.mxu1 %v1099_v48 }
 0x120   :  { %747 = vmatpush3.msra.mxu1 %v1099_v48 }
 0x121   :  { %748 = vmatprep.subr.mxu1 %v1093_v45 }
 0x122   :  { %749 = vmatpush3.msra.mxu1 %v1093_v45 }
 0x123   :  { %750 = vmatprep.subr.mxu1 %v1095_v46 }
 0x124   :  { %751 = vmatpush3.msra.mxu1 %v1095_v46 }
 0x125   :  { %752 = vmatprep.subr.mxu1 %v1089_v43 }
 0x126   :  { %753 = vmatpush3.msra.mxu1 %v1089_v43 }
 0x127   :  { %754 = vmatprep.subr.mxu1 %v1091_v44 }
 0x128   :  { %755 = vmatpush3.msra.mxu1 %v1091_v44 }
 0x129   :  { %756 = vmatprep.subr.mxu1 %v1085_v41 }
 0x12a   :  { %757 = vmatpush3.msra.mxu1 %v1085_v41 }
 0x12b   :  { %758 = vmatprep.subr.mxu1 %v1087_v42 }
 0x12c   :  { %759 = vmatpush3.msra.mxu1 %v1087_v42 }
 0x12d   :  { %760 = vmatprep.subr.mxu1 %v1081_v39 }
 0x12e   :  { %761 = vmatpush3.msra.mxu1 %v1081_v39 }
 0x12f   :  { %762 = vmatprep.subr.mxu1 %v1083_v40 }
 0x130   :  { %763 = vmatpush3.msra.mxu1 %v1083_v40 }
 0x131   :  { %764 = vmatprep.subr.mxu1 %v1077_v37 }
 0x132   :  { %765 = vmatpush3.msra.mxu1 %v1077_v37 }
 0x133   :  { %766 = vmatprep.subr.mxu1 %v1079_v38 }
 0x134   :  { %767 = vmatpush3.msra.mxu1 %v1079_v38 }
 0x135   :  { %768 = vmatprep.subr.mxu1 %v1073_v35 }
 0x136   :  { %769 = vmatpush3.msra.mxu1 %v1073_v35 }
 0x137   :  { %770 = vmatprep.subr.mxu1 %v1075_v36 }
 0x138   :  { %771 = vmatpush3.msra.mxu1 %v1075_v36 }
 0x139   :  { %773 = vmatmul.mubr.f32.vlgmr.msra.gmra.mxu1 %v1020_v17  ;;  %831 = vmatprep.subr.mxu1 %v924_v51 }
 0x13a   :  { %775 = vmatprep.mubr.f32.mxu1 %v1023_v18  ;;  %v237_v18 = vadd.f32 %v1101_v49, %v958_v0 }
 0x13d   :  { %776 = vmatmul.mubr.f32.gmra.mxu1 %v1028_v19 }
 0x13e   :  { %778 = vmatprep.mubr.f32.mxu1 %v1030_v20  ;;  %v235_v20 = vadd.f32 %v1097_v47, %v964_v2 }
 0x141   :  { %779 = vmatmul.mubr.f32.gmra.mxu1 %v1034_v21 }
 0x142   :  { %781 = vmatprep.mubr.f32.mxu1 %v1036_v22  ;;  %v236_v22 = vadd.f32 %v1104_v50, %v960_v1  ;;  %v232_v1 = vadd.f32 %v1095_v46, %v976_v6  ;;  %v230_v6 = vadd.f32 %v1091_v44, %v984_v8  ;;  %v228_v8 = vadd.f32 %v1087_v42, %v992_v10 }
 0x143   :  { %v226_v42 = vadd.f32 %v1083_v40, %v1000_v12  ;;  %v224_v40 = vadd.f32 %v1079_v38, %v1008_v14  ;;  %v420_v14 = vpop.permute.xlu0 %419 }
 0x145   :  { %782 = vmatmul.mubr.f32.gmra.mxu1 %v1040_v23 }
 0x146   :  { %784 = vmatprep.mubr.f32.mxu1 %v1042_v24 }
 0x149   :  { %785 = vmatmul.mubr.f32.gmra.mxu1 %v1046_v25  ;;  %v234_v25 = vadd.f32 %v1099_v48, %v968_v3  ;;  %v231_v3 = vadd.f32 %v1089_v43, %v980_v7  ;;  %v229_v7 = vadd.f32 %v1085_v41, %v988_v9  ;;  %v227_v9 = vadd.f32 %v1081_v39, %v996_v11 }
 0x14a   :  { %787 = vmatprep.mubr.f32.mxu1 %v1048_v26  ;;  %v225_v11 = vadd.f32 %v1077_v37, %v1004_v13  ;;  %v223_v13 = vadd.f32 %v1073_v35, %v1012_v15 }
 0x14d   :  { %788 = vmatmul.mubr.f32.gmra.mxu1 %v1052_v27 }
 0x14e   :  { %790 = vmatprep.mubr.f32.mxu1 %v1054_v28  ;;  %v233_v28 = vadd.f32 %v1093_v45, %v972_v5 }
 0x151   :  { %791 = vmatmul.mubr.f32.gmra.mxu1 %v1058_v29 }
 0x152   :  { %793 = vmatprep.mubr.f32.mxu1 %v1060_v30 }
 0x155   :  { %794 = vmatmul.mubr.f32.gmra.mxu1 %v1064_v31 }
 0x156   :  { %863 = vmatprep.mubr.msk.f32.mxu1 %vm925_vm0, %v924_v51 }
 0x1f9   :  { %v1156_v52 = vpop.f32.mrf.mxu1 }
 0x1fa   :  { %v384_v38 = vadd.f32 %v1156_v52, %v223_v13 }
 0x1fb   :  { %v1158_v53 = vpop.f32.mrf.mxu1 }
 0x1fc   :  { %v400_v52 = vmul.f32 0.33333334, %v384_v38 }
 0x1fd   :  { %v1160_v54 = vpop.f32.mrf.mxu1 }
 0x1fe   :  { %v386_v12 = vadd.f32 %v1160_v54, %v225_v11  ;;  %v222_v54 = vadd.f32 %v1075_v36, %v1016_v16  ;;  %v427_v16 = vpop.permute.xlu0 %426 }
 0x1ff   :  { %v1162_v55 = vpop.f32.mrf.mxu1 }
 0x200   :  { %v385_v37 = vadd.f32 %v1162_v55, %v224_v40  ;;  %v383_v15 = vadd.f32 %v1158_v53, %v222_v54  ;;  %v926_v53 = vmov 1.0  }
 0x201   :  { %v1164_v56 = vpop.f32.mrf.mxu1 }
 0x202   :  { %v388_v10 = vadd.f32 %v1164_v56, %v227_v9  ;;  %v402_v56 = vmul.f32 0.33333334, %v386_v12  ;;  %v401_v35 = vmul.f32 0.33333334, %v385_v37  ;;  %v399_v36 = vmul.f32 0.33333334, %v383_v15 }
 0x203   :  { %v1166_v57 = vpop.f32.mrf.mxu1 }
 0x204   :  { %v387_v39 = vadd.f32 %v1166_v57, %v226_v42  ;;  %v404_v49 = vmul.f32 0.33333334, %v388_v10  ;;  %v415_v57 = vlaneseq }
 0x205   :  { %v783_v58 = vpop.f32.mrf.mxu1 }
 0x206   :  { %v390_v45 = vadd.f32 %v783_v58, %v229_v7  ;;  %v403_v50 = vmul.f32 0.33333334, %v387_v39  ;;  %v416_v55 = vand.u32 127, %v415_v57 }
 0x207   :  { %v334_v59 = vpop.f32.mrf.mxu1 }
 0x208   :  { %v389_v41 = vadd.f32 %v334_v59, %v228_v8  ;;  %v406_v47 = vmul.f32 0.33333334, %v390_v45  ;;  %vm421_vm1 = vcmp.eq.s32.totalorder %v416_v55, %v420_v14  ;;  %vm428_vm2 = vcmp.eq.s32.totalorder %v416_v55, %v427_v16 }
 0x209   :  { %v786_v60 = vpop.f32.mrf.mxu1 }
 0x20a   :  { %v392_v32 = vadd.f32 %v786_v60, %v231_v3  ;;  %v405_v48 = vmul.f32 0.33333334, %v389_v41 }
 0x20b   :  { %v344_v61 = vpop.f32.mrf.mxu1 }
 0x20c   :  { %v391_v34 = vadd.f32 %v344_v61, %v230_v6  ;;  %v408_v44 = vmul.f32 0.33333334, %v392_v32 }
 0x20d   :  { %v789_v62 = vpop.f32.mrf.mxu1 }
 0x20e   :  { %v394_v2 = vadd.f32 %v789_v62, %v233_v28  ;;  %v407_v46 = vmul.f32 0.33333334, %v391_v34 }
 0x20f   :  { %v354_v63 = vpop.f32.mrf.mxu1 }
 0x210   :  { %v393_v5 = vadd.f32 %v354_v63, %v232_v1  ;;  %v410_v33 = vmul.f32 0.33333334, %v394_v2 }
 0x211   :  { %v792_v4 = vpop.f32.mrf.mxu1 }
 0x212   :  { %v396_v24 = vadd.f32 %v792_v4, %v235_v20  ;;  %v409_v43 = vmul.f32 0.33333334, %v393_v5 }
 0x213   :  { %v364_v17 = vpop.f32.mrf.mxu1 }
 0x214   :  { %v395_v29 = vadd.f32 %v364_v17, %v234_v25  ;;  %v412_v30 = vmul.f32 0.33333334, %v396_v24 }
 0x215   :  { %v795_v19 = vpop.f32.mrf.mxu1 }
 0x216   :  { %v398_v21 = vadd.f32 %v795_v19, %v237_v18  ;;  %v411_v31 = vmul.f32 0.33333334, %v395_v29 }
 0x217   :  { %v374_v23 = vpop.f32.mrf.mxu1 }
 0x218   :  { %v414_v26 = vmul.f32 0.33333334, %v398_v21  ;;  %v397_v27 = vadd.f32 %v374_v23, %v236_v22 }
 0x21a   :  { %v413_v0 = vmul.f32 0.33333334, %v397_v27  ;;  %797 = vmatpush3.msra.mxu0 %v414_v26  ;;  %832 = vmatpush3.msra.mxu1 %v414_v26 }
 0x21b   :  { %798 = vmatprep.subr.mxu0 %v924_v51  ;;  %833 = vmatprep.subr.mxu1 %v924_v51 }
 0x21c   :  { %799 = vmatpush3.msra.mxu0 %v413_v0  ;;  %834 = vmatpush3.msra.mxu1 %v413_v0 }
 0x21d   :  { %800 = vmatprep.subr.mxu0 %v924_v51  ;;  %835 = vmatprep.subr.mxu1 %v924_v51 }
 0x21e   :  { %801 = vmatpush3.msra.mxu0 %v412_v30  ;;  %836 = vmatpush3.msra.mxu1 %v412_v30 }
 0x21f   :  { %802 = vmatprep.subr.mxu0 %v924_v51  ;;  %837 = vmatprep.subr.mxu1 %v924_v51 }
 0x220   :  { %803 = vmatpush3.msra.mxu0 %v411_v31  ;;  %838 = vmatpush3.msra.mxu1 %v411_v31 }
 0x221   :  { %804 = vmatprep.subr.mxu0 %v924_v51  ;;  %839 = vmatprep.subr.mxu1 %v924_v51 }
 0x222   :  { %805 = vmatpush3.msra.mxu0 %v410_v33  ;;  %840 = vmatpush3.msra.mxu1 %v410_v33 }
 0x223   :  { %806 = vmatprep.subr.mxu0 %v924_v51  ;;  %841 = vmatprep.subr.mxu1 %v924_v51 }
 0x224   :  { %807 = vmatpush3.msra.mxu0 %v409_v43  ;;  %842 = vmatpush3.msra.mxu1 %v409_v43 }
 0x225   :  { %808 = vmatprep.subr.mxu0 %v924_v51  ;;  %843 = vmatprep.subr.mxu1 %v924_v51 }
 0x226   :  { %809 = vmatpush3.msra.mxu0 %v408_v44  ;;  %844 = vmatpush3.msra.mxu1 %v408_v44 }
 0x227   :  { %810 = vmatprep.subr.mxu0 %v924_v51  ;;  %845 = vmatprep.subr.mxu1 %v924_v51 }
 0x228   :  { %811 = vmatpush3.msra.mxu0 %v407_v46  ;;  %846 = vmatpush3.msra.mxu1 %v407_v46 }
 0x229   :  { %812 = vmatprep.subr.mxu0 %v924_v51  ;;  %847 = vmatprep.subr.mxu1 %v924_v51 }
 0x22a   :  { %813 = vmatpush3.msra.mxu0 %v406_v47  ;;  %848 = vmatpush3.msra.mxu1 %v406_v47 }
 0x22b   :  { %814 = vmatprep.subr.mxu0 %v924_v51  ;;  %849 = vmatprep.subr.mxu1 %v924_v51 }
 0x22c   :  { %815 = vmatpush3.msra.mxu0 %v405_v48  ;;  %850 = vmatpush3.msra.mxu1 %v405_v48 }
 0x22d   :  { %816 = vmatprep.subr.mxu0 %v924_v51  ;;  %851 = vmatprep.subr.mxu1 %v924_v51 }
 0x22e   :  { %817 = vmatpush3.msra.mxu0 %v404_v49  ;;  %852 = vmatpush3.msra.mxu1 %v404_v49 }
 0x22f   :  { %818 = vmatprep.subr.mxu0 %v924_v51  ;;  %853 = vmatprep.subr.mxu1 %v924_v51 }
 0x230   :  { %819 = vmatpush3.msra.mxu0 %v403_v50  ;;  %854 = vmatpush3.msra.mxu1 %v403_v50 }
 0x231   :  { %820 = vmatprep.subr.mxu0 %v924_v51  ;;  %855 = vmatprep.subr.mxu1 %v924_v51 }
 0x232   :  { %821 = vmatpush3.msra.mxu0 %v402_v56  ;;  %856 = vmatpush3.msra.mxu1 %v402_v56 }
 0x233   :  { %822 = vmatprep.subr.mxu0 %v924_v51  ;;  %857 = vmatprep.subr.mxu1 %v924_v51 }
 0x234   :  { %823 = vmatpush3.msra.mxu0 %v401_v35  ;;  %858 = vmatpush3.msra.mxu1 %v401_v35 }
 0x235   :  { %824 = vmatprep.subr.mxu0 %v924_v51  ;;  %859 = vmatprep.subr.mxu1 %v924_v51 }
 0x236   :  { %825 = vmatpush3.msra.mxu0 %v400_v52  ;;  %860 = vmatpush3.msra.mxu1 %v400_v52 }
 0x237   :  { %826 = vmatprep.subr.mxu0 %v924_v51  ;;  %861 = vmatprep.subr.mxu1 %v924_v51 }
 0x238   :  { %827 = vmatpush3.msra.mxu0 %v399_v36  ;;  %862 = vmatpush3.msra.mxu1 %v399_v36 }
 0x239   :  { %829 = vmatmul.mubr.msk.f32.vlgmr.msra.gmra.mxu0 %vm421_vm1, %v926_v53  ;;  %864 = vmatmul.mubr.msk.f32.vlgmr.msra.gmra.mxu1 %vm428_vm2, %v926_v53 }
 0x2f9   :  { %v497_v58 = vpop.f32.mrf.mxu0  ;;  %v567_v59 = vpop.f32.mrf.mxu1 }
 0x2fa   :  { %v571_v60 = vmul.f32 %v567_v59, %v497_v58 }
 0x2fb   :  { %v830_v61 = vpop.f32.mrf.mxu0  ;;  %v865_v62 = vpop.f32.mrf.mxu1 }
 0x2fc   :  { %572 = vadd.xlane.f32.xlu1 %v571_v60 }
 0x385   :  { %v573_v63 = vpop.xlane.xlu1 %572 }
 0x386   :  { %575 = vst.msk [vmem:[%s1243_s4] sm:$0xff] %vm574_vm3, %v573_v63 }
 0x387   :  { %580 = vsyncpa [#allocation3], 1 }
 0x388   :  { %581 = vsyncpa [#allocation5], 1 }

</bundles_post_ra>
